<compile_context>
chip_gen: v6e
topology: v6e:2x2x1
jax: 0.10.0
libtpu: 0.0.40
codegen_flags: <defaults>
</compile_context>

<pallas_src>
import functools

import jax
import jax.numpy as jnp
from jax.experimental import pallas as pl
from jax.experimental.pallas import tpu as pltpu

_BN_EPS = 1e-5


@functools.lru_cache(maxsize=None)
def _roll_shift_sign():
    """One-time 1-vreg probe of pltpu.roll's rotation convention.

    The stencil needs taps tap[p] = state[p + d].  Under np.roll-style
    semantics that is roll(state, -d); under the opposite convention it is
    roll(state, +d).  Probing once keeps the tap direction correct across
    backends / jax versions and costs nothing at steady state.
    """
    x = jnp.arange(8 * 128, dtype=jnp.float32).reshape(8, 128)

    def probe(x_ref, o_ref):
        o_ref[...] = pltpu.roll(x_ref[...], 1, 1)

    y = pl.pallas_call(probe, out_shape=jax.ShapeDtypeStruct((8, 128), jnp.float32))(x)
    return -1 if bool(jnp.array_equal(y, jnp.roll(x, 1, axis=1))) else 1


def _make_recurrent_kernel(N, C, H, W, t, roll_sign):
    """Builds the fused kernel body; all sizes / trip counts are trace-time
    Python constants, so every loop below unrolls."""
    HW = H * W
    NHW = N * HW
    inv_cnt = 1.0 / float(N * HW)
    n_convs = t + 1  # the PyTorch loop applies conv 1 + t times (t >= 1)

    def kernel(x_ref, w_ref, b_ref, g_ref, be_ref, m_ref, o_ref):
        # x_ref  : (N, C, HW)  VMEM  input, lane-dense (HW on lanes)
        # w_ref  : (C, 9*C)    VMEM  packed weights: w[co, (kh*3+kw)*Cin + ci]
        # b_ref  : (C, 1)      VMEM  conv bias        (column vectors that
        # g_ref  : (C, 1)      VMEM  BN gamma          broadcast along lanes
        # be_ref : (C, 1)      VMEM  BN beta           over the packed acc)
        # m_ref  : (9, NHW)    VMEM  f32 tap-validity masks, row = kh*3 + kw
        # o_ref  : (N, C, HW)  VMEM  output

        # Channel-on-sublane, lane-dense state (C, N*HW), built once with an
        # aligned lane concat (offsets are multiples of HW = 256).  The
        # recurrent state then stays in vregs for the whole kernel.
        x_cn = jnp.concatenate([x_ref[n] for n in range(N)], axis=1)  # (C, NHW)

        bias = b_ref[...]     # (C, 1)
        gamma = g_ref[...]    # (C, 1)
        beta = be_ref[...]    # (C, 1)
        wmat = w_ref[...]     # (C, 9*C), vreg-resident across all convs

        def conv_bn_relu(cur):
            """3x3 conv (pad=1, bias) + training-mode BatchNorm + ReLU."""
            acc = jnp.zeros((C, NHW), jnp.float32)
            for kh in range(3):
                for kw in range(3):
                    d = (kh - 1) * W + (kw - 1)   # flat lane offset of this tap
                    j = kh * 3 + kw
                    if d == 0:
                        tap = cur
                    else:
                        # In-register shift on the XLU: tap[p] = cur[p + d];
                        # lanes that wrapped across a row / image edge are
                        # zeroed by the precomputed mask.
                        tap = (pltpu.roll(cur, (roll_sign * d) % NHW, 1)
                               * m_ref[j:j + 1, :])
                    # One packed FMA per input channel: all output channels at
                    # once ((1, NHW) tap row x (C_out, 1) weight column).
                    for ci in range(C):
                        col = j * C + ci
                        acc = acc + tap[ci:ci + 1, :] * wmat[:, col:col + 1]
            acc = acc + bias

            # BatchNorm2d with batch statistics (biased variance, two-pass for
            # numerical safety), folded scale/shift, then ReLU.  One lane-axis
            # reduction per statistic covers every channel (sublane row).
            mean = jnp.sum(acc, axis=1, keepdims=True) * inv_cnt        # (C, 1)
            diff = acc - mean
            var = jnp.sum(diff * diff, axis=1, keepdims=True) * inv_cnt  # (C, 1)
            scale = gamma * jax.lax.rsqrt(var + _BN_EPS)
            return jnp.maximum(diff * scale + beta, 0.0)

        # ---- the recurrence, fully fused and vreg-resident ----
        x1 = conv_bn_relu(x_cn)                  # i == 0 : conv(x)
        for _ in range(n_convs - 1):
            x1 = conv_bn_relu(x_cn + x1)         #          conv(x + x1)

        # Coalesced output: one lane-dense (C, HW) slab per batch image
        # (instead of C single-sublane-row masked stores).
        for n in range(N):
            o_ref[n] = x1[:, n * HW:(n + 1) * HW]

    return kernel


def recurrent_block(x_nchw, w, b, gamma, beta, t=2):
    """Forward pass of Recurrent_block.

    x_nchw      : (N, C, H, W) float32, NCHW (PyTorch layout)
    w           : (3, 3, C, C) float32, conv weight in (kh, kw, cin, cout) order
    b           : (C,) conv bias
    gamma, beta : (C,) BatchNorm affine parameters
    """
    assert t >= 1, "Recurrent_block.forward requires t >= 1"
    N, C, H, W = x_nchw.shape
    HW, NHW = H * W, N * H * W

    x_flat = x_nchw.reshape(N, C, HW).astype(jnp.float32)   # free reshape

    # Packed weights: w_packed[co, (kh*3+kw)*C + ci] = w[kh, kw, ci, co].
    w_packed = jnp.transpose(w.astype(jnp.float32), (3, 0, 1, 2)).reshape(C, 9 * C)
    bias_col = b.astype(jnp.float32).reshape(C, 1)
    gamma_col = gamma.astype(jnp.float32).reshape(C, 1)
    beta_col = beta.astype(jnp.float32).reshape(C, 1)

    # Constant tap-validity masks over the flattened (N*H*W) lane axis:
    # tap (kh, kw) reads input pixel (h + kh - 1, w + kw - 1).
    pos = jnp.arange(NHW, dtype=jnp.int32)
    hh = (pos // W) % H
    ww = pos % W

    def _valid(idx, k, size):
        if k == 0:
            return idx >= 1
        if k == 2:
            return idx <= size - 2
        return jnp.ones(idx.shape, dtype=bool)

    masks = jnp.stack(
        [(_valid(hh, kh, H) & _valid(ww, kw, W)).astype(jnp.float32)
         for kh in range(3) for kw in range(3)], axis=0)             # (9, NHW)

    kernel = _make_recurrent_kernel(N, C, H, W, t, _roll_shift_sign())

    out = pl.pallas_call(
        kernel,
        out_shape=jax.ShapeDtypeStruct((N, C, HW), jnp.float32),
        grid=(1,),
        in_specs=[
            pl.BlockSpec((N, C, HW), lambda i: (0, 0, 0)),   # x
            pl.BlockSpec((C, 9 * C), lambda i: (0, 0)),      # packed weights
            pl.BlockSpec((C, 1), lambda i: (0, 0)),          # conv bias
            pl.BlockSpec((C, 1), lambda i: (0, 0)),          # BN gamma
            pl.BlockSpec((C, 1), lambda i: (0, 0)),          # BN beta
            pl.BlockSpec((9, NHW), lambda i: (0, 0)),        # tap masks
        ],
        out_specs=pl.BlockSpec((N, C, HW), lambda i: (0, 0, 0)),
        compiler_params=pltpu.CompilerParams(
            dimension_semantics=("arbitrary",),
            vmem_limit_bytes=16 * 1024 * 1024,
        ),
    )(x_flat, w_packed, bias_col, gamma_col, beta_col, masks)

    return out.reshape(N, C, H, W)


# ----------------------------- pure-JAX reference -----------------------------
def _reference(x, w, b, gamma, beta, t):
    """Direct port of the PyTorch module (training-mode BatchNorm), incl. bias."""
    def cbr(z):
        y = jax.lax.conv_general_dilated(
            z, w, window_strides=(1, 1), padding="SAME",
            dimension_numbers=("NCHW", "HWIO", "NCHW"),
            precision=jax.lax.Precision.HIGHEST)
        y = y + b[None, :, None, None]
        m = jnp.mean(y, axis=(0, 2, 3), keepdims=True)
        v = jnp.mean((y - m) ** 2, axis=(0, 2, 3), keepdims=True)
        y = (y - m) * jax.lax.rsqrt(v + _BN_EPS)
        y = y * gamma[None, :, None, None] + beta[None, :, None, None]
        return jnp.maximum(y, 0.0)

    x1 = None
    for i in range(t):
        if i == 0:
            x1 = cbr(x)
        x1 = cbr(x + x1)
    return x1


if __name__ == "__main__":
    ch_out, t = 4, 2
    N, H, W = 2, 16, 16

    key = jax.random.PRNGKey(0)
    kx, kw, kb = jax.random.split(key, 3)

    # Deterministic synthetic params (Conv2d kaiming-uniform-like bounds);
    # BatchNorm2d defaults: weight=1, bias=0.
    fan_in = ch_out * 3 * 3
    bound = 1.0 / (fan_in ** 0.5)
    w = jax.random.uniform(kw, (3, 3, ch_out, ch_out), jnp.float32, -bound, bound)
    b = jax.random.uniform(kb, (ch_out,), jnp.float32, -bound, bound)
    gamma = jnp.ones((ch_out,), jnp.float32)
    beta = jnp.zeros((ch_out,), jnp.float32)

    x = jax.random.normal(kx, (N, ch_out, H, W), jnp.float32)  # NCHW input

    y = recurrent_block(x, w, b, gamma, beta, t=t)
    jax.block_until_ready(y)
    assert y.shape == (N, ch_out, H, W)

    y_ref = _reference(x, w, b, gamma, beta, t)
    err = float(jnp.max(jnp.abs(y - y_ref)))
    assert err < 1e-3, f"kernel/reference mismatch: max abs err = {err}"

    print("KERNEL_OK")
</pallas_src>

<mosaic_0001>
module attributes {stable_mosaic.version = 11 : i64} {
  func.func @probe(%arg0: memref<8x128xf32, #tpu.memory_space<vmem>>, %arg1: memref<8x128xf32, #tpu.memory_space<vmem>>) attributes {dimension_semantics = [], scalar_prefetch = 0 : i64, scratch_operands = 0 : i64, tpu.core_type = #tpu.core_type<tc>} {
    %c0 = arith.constant 0 : index
    %c0_0 = arith.constant 0 : index
    %0 = vector.load %arg0[%c0, %c0_0] : memref<8x128xf32, #tpu.memory_space<vmem>>, vector<8x128xf32>
    %c1_i32 = arith.constant 1 : i32
    %1 = tpu.dynamic_rotate %0 by %c1_i32 dim 1 : vector<8x128xf32>, i32 -> vector<8x128xf32>
    %c0_1 = arith.constant 0 : index
    %c0_2 = arith.constant 0 : index
    %2 = vector.load %arg1[%c0_1, %c0_2] : memref<8x128xf32, #tpu.memory_space<vmem>>, vector<8x128xf32>
    tpu.vector_store %arg1[%c0_1, %c0_2], %1 {strides = array<i32>} : memref<8x128xf32, #tpu.memory_space<vmem>>, vector<8x128xf32>,
    return
  }
}

</mosaic_0001>

<bundles_post_ra>
// kernel: tpu_custom_call.1
= control target key start
LH: loop header
LB: loop body
LE: loop exit
PB: predicated region body
PF: predicated region fallthrough
CT: control target
= control target key end

     0   :  { %6 = vsyncpa [#allocation3], 0  ;;  %s106_s0 = inlined_call_operand.hbm [shape: f32[8,128], index: 0, kind: input, shape index: {}]   ;;  %s107_s1 = inlined_call_operand.hbm [shape: f32[8,128], index: 1, kind: output, shape index: {}]  }
   0x1   :  { %7 = vsyncpa [#allocation4], 0  ;;  %s87_s6 = smov [#allocation2]  }
   0x2   :  { %s14_s7 = sshll.u32 %s87_s6, 4  ;;  %s15_s7 = int_to_ptr.vmem [resolvable:$true] %s14_s7 }
   0x3   :  { %s51_s8 = scalar_lea.vmem %s15_s7, 128  ;;  %p56_p1 = scmp.lt.s32.totalorder %s15_s7, %s15_s7 }
   0x4   :  { %p52_p0 = scmp.ne.s32.totalorder %s15_s7, %s51_s8  ;;  %p57_p2 = scmp.lt.s32.totalorder %s51_s8, %s51_s8 }
   0x6   :  { %p58_p3 = por %p57_p2, %p56_p1 }
   0x8   :  { %p59_p4 = pnand %p58_p3, %p52_p0 }
   0xa   :  { %62 = shalt.err (!%p59_p4)
}
   0xb   :  { %17 = dma.hbm_to_vmem [thread:$0]  %s106_s0, 128, %s15_s7, [#allocation3]  }
   0xc   :  { %83 = dma.done.wait [#allocation3], 128  }
   0xd   :  { %84 = vsyncadd [#allocation3], 4294967168  ;;  %v21_v0 = vld [vmem:[#allocation2] sm:$0xff]  ;;  %s88_s11 = smov 1   ;;  %s89_s12 = smov [#allocation5]  }
   0xe   :  { %22 = vrot.lane.b32.xlu0 %v21_v0, %s88_s11  ;;  %s31_s13 = sshll.u32 %s89_s12, 4  ;;  %s32_s13 = int_to_ptr.vmem [resolvable:$true] %s31_s13 }
   0xf   :  { %s63_s14 = scalar_lea.vmem %s32_s13, 128  ;;  %p68_p6 = scmp.lt.s32.totalorder %s32_s13, %s32_s13 }
  0x10   :  { %p64_p5 = scmp.ne.s32.totalorder %s32_s13, %s63_s14  ;;  %p69_p7 = scmp.lt.s32.totalorder %s63_s14, %s63_s14 }
  0x12   :  { %p70_p8 = por %p69_p7, %p68_p6 }
  0x14   :  { %p71_p9 = pnand %p70_p8, %p64_p5 }
  0x80   :  { %v23_v1 = vpop.permute.xlu0 %22 }
  0x81   :  { %24 = vst [vmem:[#allocation5] sm:$0xff] %v23_v1 }
  0x82   :  { %74 = shalt.err (!%p71_p9)
}
  0x83   :  { %34 = dma.vmem_to_hbm [thread:$0]  %s32_s13, 128, %s107_s1, [#allocation4]  }
  0x84   :  { %85 = dma.done.wait [#allocation4], 128  }
  0x85   :  { %86 = vsyncadd [#allocation4], 4294967168 }
  0x86   :  { %38 = vsyncpa [#allocation3], 1 }
  0x87   :  { %39 = vsyncpa [#allocation4], 1 }

</bundles_post_ra>
